<compile_context>
chip_gen: v5e
topology: v5e:2x2
jax: 0.10.0
libtpu: 0.0.40
codegen_flags: <defaults>
</compile_context>

<pallas_src>
import jax
import jax.numpy as jnp
from jax.experimental import pallas as pl
from jax.experimental.pallas import tpu as pltpu


_VMEM_LIMIT = 40 * 1024 * 1024  # safe on v5e/v6e (128 MiB) and v7x (64 MiB)


# ----------------------------------------------------------------------------
# Generic GEMM + bias kernels (used by the conv im2col GEMMs).
# ----------------------------------------------------------------------------
def _matmul_bias_single_k_kernel(x_ref, w_ref, b_ref, o_ref):
    # K fits in one tile: write directly, no accumulator scratch round trip.
    o_ref[...] = (
        jnp.dot(x_ref[...], w_ref[...], preferred_element_type=jnp.float32)
        + b_ref[...]
    ).astype(o_ref.dtype)


def _matmul_bias_multi_k_kernel(x_ref, w_ref, b_ref, o_ref, acc_ref):
    @pl.when(pl.program_id(2) == 0)
    def _():
        acc_ref[...] = jnp.zeros_like(acc_ref)

    acc_ref[...] += jnp.dot(
        x_ref[...], w_ref[...], preferred_element_type=jnp.float32
    )

    @pl.when(pl.program_id(2) == pl.num_programs(2) - 1)
    def _():
        o_ref[...] = (acc_ref[...] + b_ref[...]).astype(o_ref.dtype)


def _largest_divisor_leq(n, cap):
    if n <= cap:
        return n
    for d in range(cap, 0, -1):
        if n % d == 0:
            return d
    return n


def matmul_bias(x, w, b, *, tm_cap=2048, tn_cap=512, tk_cap=16384):
    """x @ w + b with a Pallas TPU kernel. x:(M,K) w:(K,N) b:(N,)."""
    M, K = x.shape
    K2, N = w.shape
    assert K == K2 and b.shape == (N,)
    tm = _largest_divisor_leq(M, tm_cap)
    tn = _largest_divisor_leq(N, tn_cap)
    tk = _largest_divisor_leq(K, tk_cap)
    b2 = b.reshape(1, N)

    if tk == K:
        # Fast path: whole K in one step -> no accumulator scratch.
        return pl.pallas_call(
            _matmul_bias_single_k_kernel,
            out_shape=jax.ShapeDtypeStruct((M, N), x.dtype),
            grid_spec=pltpu.PrefetchScalarGridSpec(
                num_scalar_prefetch=0,
                grid=(M // tm, N // tn),
                in_specs=[
                    pl.BlockSpec((tm, K), lambda i, j: (i, 0)),
                    pl.BlockSpec((K, tn), lambda i, j: (0, j)),
                    pl.BlockSpec((1, tn), lambda i, j: (0, j)),
                ],
                out_specs=pl.BlockSpec((tm, tn), lambda i, j: (i, j)),
            ),
            compiler_params=pltpu.CompilerParams(
                dimension_semantics=("parallel", "parallel"),
                vmem_limit_bytes=_VMEM_LIMIT,
            ),
        )(x, w, b2)

    # General path (not hit by this model's shapes, kept for robustness).
    return pl.pallas_call(
        _matmul_bias_multi_k_kernel,
        out_shape=jax.ShapeDtypeStruct((M, N), x.dtype),
        grid_spec=pltpu.PrefetchScalarGridSpec(
            num_scalar_prefetch=0,
            grid=(M // tm, N // tn, K // tk),
            in_specs=[
                pl.BlockSpec((tm, tk), lambda i, j, k: (i, k)),
                pl.BlockSpec((tk, tn), lambda i, j, k: (k, j)),
                pl.BlockSpec((1, tn), lambda i, j, k: (0, j)),
            ],
            out_specs=pl.BlockSpec((tm, tn), lambda i, j, k: (i, j)),
            scratch_shapes=[pltpu.VMEM((tm, tn), jnp.float32)],
        ),
        compiler_params=pltpu.CompilerParams(
            dimension_semantics=("parallel", "parallel", "arbitrary"),
            vmem_limit_bytes=_VMEM_LIMIT,
        ),
    )(x, w, b2)


# ----------------------------------------------------------------------------
# Fused heads: all three mu||logvar GEMMs in ONE pallas_call (one launch,
# continuous bf16 weight streaming, fp32 accumulation, lane-dense outputs).
# ----------------------------------------------------------------------------
def _fused_heads_kernel(f2_ref, f1_ref, f0_ref,
                        w1_ref, w2_ref, w3_ref,
                        b1_ref, b2_ref, b3_ref,
                        o1_ref, o2_ref, o3_ref):
    def head(f_ref, w_ref, b_ref, o_ref):
        # Activations are tiny (M=B rows) -> cast to bf16 so the MXU runs a native
        # bf16 x bf16 -> f32 matmul (no f32 upcast copy of the big weight tile).
        f = f_ref[...].astype(jnp.bfloat16)
        o_ref[...] = (
            jnp.dot(f, w_ref[...], preferred_element_type=jnp.float32) + b_ref[...]
        ).astype(o_ref.dtype)

    head(f2_ref, w1_ref, b1_ref, o1_ref)
    head(f1_ref, w2_ref, b2_ref, o2_ref)
    head(f0_ref, w3_ref, b3_ref, o3_ref)


def fused_heads(f2, f1, f0, w1, b1, w2, b2, w3, b3):
    B = f2.shape[0]
    ins = (f2, f1, f0, w1, w2, w3,
           b1.reshape(1, -1), b2.reshape(1, -1), b3.reshape(1, -1))
    full = lambda a: pl.BlockSpec(a.shape, lambda i: (0, 0))
    out_shapes = (
        jax.ShapeDtypeStruct((B, w1.shape[1]), f2.dtype),
        jax.ShapeDtypeStruct((B, w2.shape[1]), f2.dtype),
        jax.ShapeDtypeStruct((B, w3.shape[1]), f2.dtype),
    )
    return pl.pallas_call(
        _fused_heads_kernel,
        out_shape=out_shapes,
        grid_spec=pltpu.PrefetchScalarGridSpec(
            num_scalar_prefetch=0,
            grid=(1,),
            in_specs=[full(a) for a in ins],
            out_specs=[
                pl.BlockSpec((B, w1.shape[1]), lambda i: (0, 0)),
                pl.BlockSpec((B, w2.shape[1]), lambda i: (0, 0)),
                pl.BlockSpec((B, w3.shape[1]), lambda i: (0, 0)),
            ],
        ),
        compiler_params=pltpu.CompilerParams(
            dimension_semantics=("arbitrary",),
            vmem_limit_bytes=_VMEM_LIMIT,
        ),
    )(*ins)


# ----------------------------------------------------------------------------
# 4x4 stride-2 pad-1 conv lowered to the Pallas GEMM (im2col is cheap XLA glue;
# after the in_conv fold its intermediates total <0.7 MiB per forward).
# ----------------------------------------------------------------------------
def conv4x4_s2_p1(x_nhwc, w_kn, b):
    B, H, W, Cin = x_nhwc.shape
    Cout = w_kn.shape[1]
    k, s, p = 4, 2, 1
    xp = jnp.pad(x_nhwc, ((0, 0), (p, p), (p, p), (0, 0)))
    Ho = (H + 2 * p - k) // s + 1
    Wo = (W + 2 * p - k) // s + 1
    patches = []
    for kh in range(k):
        for kw in range(k):
            patches.append(xp[:, kh:kh + s * Ho:s, kw:kw + s * Wo:s, :])
    cols = jnp.stack(patches, axis=3)                       # (B,Ho,Wo,16,Cin)
    cols = cols.reshape(B * Ho * Wo, k * k * Cin)           # row order (kh,kw,c)
    out = matmul_bias(cols, w_kn, b)
    return out.reshape(B, Ho, Wo, Cout)


# ----------------------------------------------------------------------------
# Parameter init (PyTorch-layout weights, deterministic uniform(+-1/sqrt(fan)))
# ----------------------------------------------------------------------------
def init_params(key):
    def u(k, shape, fan_in):
        bound = 1.0 / jnp.sqrt(fan_in)
        return jax.random.uniform(k, shape, jnp.float32, -bound, bound)

    keys = jax.random.split(key, 18)
    p = {}
    p["in_conv_w"] = u(keys[0], (32, 3, 1, 1), 3)
    p["in_conv_b"] = u(keys[1], (32,), 3)
    p["down1_w"] = u(keys[2], (64, 32, 4, 4), 32 * 16)
    p["down1_b"] = u(keys[3], (64,), 32 * 16)
    p["down2_w"] = u(keys[4], (128, 64, 4, 4), 64 * 16)
    p["down2_b"] = u(keys[5], (128,), 64 * 16)
    p["fc_mu1_w"] = u(keys[6], (64, 128 * 8 * 8), 128 * 8 * 8)
    p["fc_mu1_b"] = u(keys[7], (64,), 128 * 8 * 8)
    p["fc_logvar1_w"] = u(keys[8], (64, 128 * 8 * 8), 128 * 8 * 8)
    p["fc_logvar1_b"] = u(keys[9], (64,), 128 * 8 * 8)
    p["fc_mu2_w"] = u(keys[10], (128, 64 * 16 * 16), 64 * 16 * 16)
    p["fc_mu2_b"] = u(keys[11], (128,), 64 * 16 * 16)
    p["fc_logvar2_w"] = u(keys[12], (128, 64 * 16 * 16), 64 * 16 * 16)
    p["fc_logvar2_b"] = u(keys[13], (128,), 64 * 16 * 16)
    p["fc_mu3_w"] = u(keys[14], (256, 32 * 32 * 32), 32 * 32 * 32)
    p["fc_mu3_b"] = u(keys[15], (256,), 32 * 32 * 32)
    p["fc_logvar3_w"] = u(keys[16], (256, 32 * 32 * 32), 32 * 32 * 32)
    p["fc_logvar3_b"] = u(keys[17], (256,), 32 * 32 * 32)
    return p


# ----------------------------------------------------------------------------
# One-time weight preparation (exact algebraic folds of the all-linear module):
#  * in_conv folded into down1 (const-channel trick keeps zero padding exact)
#  * in_conv (weights + bias) folded into head3: K 32768 -> 3072
#  * conv weights -> im2col GEMM layout; FC rows permuted (C,H,W) -> (H,W,C)
#  * mu/logvar pairs concatenated along N; head weights cast to bf16
# ----------------------------------------------------------------------------
def prepare_params(p):
    q = {}
    Wc = p["in_conv_w"][:, :, 0, 0]                          # (32, 3)
    bc = p["in_conv_b"]                                       # (32,)

    # ---- in_conv -> down1 fold (4th constant input channel carries bc) ----
    Wc_aug = jnp.concatenate([Wc, bc[:, None]], axis=1)       # (32, 4)
    Wd1f = jnp.einsum("oikl,ij->ojkl", p["down1_w"], Wc_aug)  # (64, 4, 4, 4)
    q["down1_w"] = jnp.transpose(Wd1f, (2, 3, 1, 0)).reshape(4 * 4 * 4, 64)
    q["down1_b"] = p["down1_b"]

    # ---- down2 -> im2col GEMM layout ----
    q["down2_w"] = jnp.transpose(p["down2_w"], (2, 3, 1, 0)).reshape(4 * 4 * 64, 128)
    q["down2_b"] = p["down2_b"]

    # ---- fused mu||logvar heads (rows permuted to NHWC flatten order) ----
    def fused_head(wmu, bmu, wlv, blv, C, H, W):
        def perm(w):  # (out, C*H*W) (C,H,W) order -> (H*W*C, out) (H,W,C) order
            out = w.shape[0]
            return jnp.transpose(w.reshape(out, C, H, W), (2, 3, 1, 0)).reshape(H * W * C, out)
        return (jnp.concatenate([perm(wmu), perm(wlv)], axis=1),
                jnp.concatenate([bmu, blv], axis=0))

    w1, b1 = fused_head(p["fc_mu1_w"], p["fc_mu1_b"],
                        p["fc_logvar1_w"], p["fc_logvar1_b"], 128, 8, 8)
    w2, b2 = fused_head(p["fc_mu2_w"], p["fc_mu2_b"],
                        p["fc_logvar2_w"], p["fc_logvar2_b"], 64, 16, 16)

    # ---- head3 with in_conv folded in: consumes the raw input flatten ----
    w3_full = jnp.concatenate([p["fc_mu3_w"], p["fc_logvar3_w"]], axis=0)   # (512, 32768)
    b3_full = jnp.concatenate([p["fc_mu3_b"], p["fc_logvar3_b"]], axis=0)   # (512,)
    w3_r = w3_full.reshape(512, 32, 32, 32)                                 # (n, c, h, w)
    w3 = jnp.einsum("nchw,ci->hwin", w3_r, Wc).reshape(32 * 32 * 3, 512)
    b3 = b3_full + jnp.einsum("nchw,c->n", w3_r, bc)

    # bf16 weight streaming for the heads (fp32 accumulation in-kernel).
    q["head1_w"], q["head1_b"] = w1.astype(jnp.bfloat16), b1
    q["head2_w"], q["head2_b"] = w2.astype(jnp.bfloat16), b2
    q["head3_w"], q["head3_b"] = w3.astype(jnp.bfloat16), b3
    return q


# ----------------------------------------------------------------------------
# Forward pass (mirrors HierarchicalEncoder.forward; the module is purely
# linear — no activations in the PyTorch spec — so the folds are exact).
# ----------------------------------------------------------------------------
def hierarchical_encoder(x_nchw, q):
    B = x_nchw.shape[0]
    x = jnp.transpose(x_nchw, (0, 2, 3, 1))                       # (B,32,32,3) NHWC
    x_aug = jnp.concatenate([x, jnp.ones((B, 32, 32, 1), x.dtype)], axis=-1)

    x1 = conv4x4_s2_p1(x_aug, q["down1_w"], q["down1_b"])         # (B,16,16,64) in_conv folded
    x2 = conv4x4_s2_p1(x1, q["down2_w"], q["down2_b"])            # (B,8,8,128)

    f2 = x2.reshape(B, -1)                                        # (B, 8192)
    f1 = x1.reshape(B, -1)                                        # (B, 16384)
    f0 = x.reshape(B, -1)                                         # (B, 3072) raw input

    h1, h2, h3 = fused_heads(f2, f1, f0,
                             q["head1_w"], q["head1_b"],
                             q["head2_w"], q["head2_b"],
                             q["head3_w"], q["head3_b"])

    mu1, logvar1 = h1[:, :64], h1[:, 64:]
    mu2, logvar2 = h2[:, :128], h2[:, 128:]
    mu3, logvar3 = h3[:, :256], h3[:, 256:]
    return [(mu1, logvar1), (mu2, logvar2), (mu3, logvar3)]


# ----------------------------------------------------------------------------
# Pure-JAX reference (NCHW, lax.conv, original PyTorch-layout fp32 weights)
# ----------------------------------------------------------------------------
def reference_forward(x, params):
    def conv(x, w, b, stride, pad):
        y = jax.lax.conv_general_dilated(
            x, w, (stride, stride), [(pad, pad), (pad, pad)],
            dimension_numbers=("NCHW", "OIHW", "NCHW"))
        return y + b[None, :, None, None]

    B = x.shape[0]
    x0 = conv(x, params["in_conv_w"], params["in_conv_b"], 1, 0)
    x1 = conv(x0, params["down1_w"], params["down1_b"], 2, 1)
    x2 = conv(x1, params["down2_w"], params["down2_b"], 2, 1)
    lin = lambda f, w, b: f @ w.T + b
    f0, f1, f2 = x0.reshape(B, -1), x1.reshape(B, -1), x2.reshape(B, -1)
    return [
        (lin(f2, params["fc_mu1_w"], params["fc_mu1_b"]),
         lin(f2, params["fc_logvar1_w"], params["fc_logvar1_b"])),
        (lin(f1, params["fc_mu2_w"], params["fc_mu2_b"]),
         lin(f1, params["fc_logvar2_w"], params["fc_logvar2_b"])),
        (lin(f0, params["fc_mu3_w"], params["fc_mu3_b"]),
         lin(f0, params["fc_logvar3_w"], params["fc_logvar3_b"])),
    ]


if __name__ == "__main__":
    key = jax.random.PRNGKey(0)
    kx, kp = jax.random.split(key)

    B = 2
    x = jax.random.normal(kx, (B, 3, 32, 32), dtype=jnp.float32)  # NCHW, as in PyTorch
    params = init_params(kp)
    prepped = prepare_params(params)      # one-time weight folding / layout prep

    outs = jax.block_until_ready(hierarchical_encoder(x, prepped))
    refs = jax.block_until_ready(reference_forward(x, params))

    # 3e-3 tolerance covers bf16 weight streaming (K up to 16384, fp32 accumulation);
    # observed error is well inside this on random data.
    for (mu, lv), (rmu, rlv) in zip(outs, refs):
        assert jnp.allclose(mu, rmu, rtol=3e-3, atol=3e-3), "mu mismatch"
        assert jnp.allclose(lv, rlv, rtol=3e-3, atol=3e-3), "logvar mismatch"

    assert outs[0][0].shape == (B, 64) and outs[0][1].shape == (B, 64)
    assert outs[1][0].shape == (B, 128) and outs[1][1].shape == (B, 128)
    assert outs[2][0].shape == (B, 256) and outs[2][1].shape == (B, 256)

    print("KERNEL_OK")
</pallas_src>

<mosaic_0001>
module attributes {stable_mosaic.version = 11 : i64} {
  func.func @_matmul_bias_single_k_kernel(%arg0: i32, %arg1: i32, %arg2: memref<512x64xf32, #tpu.memory_space<vmem>>, %arg3: memref<64x64xf32, #tpu.memory_space<vmem>>, %arg4: memref<1x64xf32, #tpu.memory_space<vmem>>, %arg5: memref<512x64xf32, #tpu.memory_space<vmem>>) attributes {dimension_semantics = [#tpu.dimension_semantics<parallel>, #tpu.dimension_semantics<parallel>], iteration_bounds = array<i64: 1, 1>, scalar_prefetch = 0 : i64, scratch_operands = 0 : i64, tpu.core_type = #tpu.core_type<tc>, window_params = [{transform_indices = @transform_0, window_bounds = array<i64: 512, 64>}, {transform_indices = @transform_1, window_bounds = array<i64: 64, 64>}, {transform_indices = @transform_2, window_bounds = array<i64: 1, 64>}, {transform_indices = @transform_3, window_bounds = array<i64: 512, 64>}]} {
    %c0 = arith.constant 0 : index
    %c0_0 = arith.constant 0 : index
    %0 = vector.load %arg2[%c0, %c0_0] : memref<512x64xf32, #tpu.memory_space<vmem>>, vector<512x64xf32>
    %c0_1 = arith.constant 0 : index
    %c0_2 = arith.constant 0 : index
    %1 = vector.load %arg3[%c0_1, %c0_2] : memref<64x64xf32, #tpu.memory_space<vmem>>, vector<64x64xf32>
    %cst = arith.constant dense<0.000000e+00> : vector<512x64xf32>
    %2 = tpu.matmul %0, %1, %cst {dimension_numbers = #tpu.dot_dimension_numbers<[1], [0], [0], [1], [0, 0, 1, 1], [], []>} : vector<512x64xf32>, vector<64x64xf32>, vector<512x64xf32> -> vector<512x64xf32>
    %c0_3 = arith.constant 0 : index
    %c0_4 = arith.constant 0 : index
    %3 = vector.load %arg4[%c0_3, %c0_4] : memref<1x64xf32, #tpu.memory_space<vmem>>, vector<1x64xf32>
    %4 = vector.broadcast %3 : vector<1x64xf32> to vector<512x64xf32>
    %5 = arith.addf %2, %4 : vector<512x64xf32>
    %c0_5 = arith.constant 0 : index
    %c0_6 = arith.constant 0 : index
    %6 = vector.load %arg5[%c0_5, %c0_6] : memref<512x64xf32, #tpu.memory_space<vmem>>, vector<512x64xf32>
    tpu.vector_store %arg5[%c0_5, %c0_6], %5 {strides = array<i32>} : memref<512x64xf32, #tpu.memory_space<vmem>>, vector<512x64xf32>,
    return
  }
  func.func @transform_0(%arg0: i32, %arg1: i32) -> (i32, i32) {
    %c0_i32 = arith.constant 0 : i32
    %c0_i32_0 = arith.constant 0 : i32
    return %arg0, %c0_i32 : i32, i32
  }
  func.func @transform_1(%arg0: i32, %arg1: i32) -> (i32, i32) {
    %c0_i32 = arith.constant 0 : i32
    %c0_i32_0 = arith.constant 0 : i32
    return %c0_i32, %arg1 : i32, i32
  }
  func.func @transform_2(%arg0: i32, %arg1: i32) -> (i32, i32) {
    %c0_i32 = arith.constant 0 : i32
    %c0_i32_0 = arith.constant 0 : i32
    return %c0_i32, %arg1 : i32, i32
  }
  func.func @transform_3(%arg0: i32, %arg1: i32) -> (i32, i32) {
    %c0_i32 = arith.constant 0 : i32
    return %arg0, %arg1 : i32, i32
  }
}

</mosaic_0001>

<bundles_post_ra>
// kernel: tpu_custom_call.1
= control target key start
LH: loop header
LB: loop body
LE: loop exit
PB: predicated region body
PF: predicated region fallthrough
CT: control target
= control target key end

     0   :  { %vm90_vm0 = vcmask 523264   ;;  %s1274_s1 = inlined_call_operand.vmem [shape: f32[64,64], index: 1, kind: input, shape index: {}]   ;;  %s1275_s0 = inlined_call_operand.vmem [shape: f32[512,64], index: 0, kind: input, shape index: {}]   ;;  %s1276_s2 = inlined_call_operand.vmem [shape: f32[1,64], index: 2, kind: input, shape index: {}]   ;;  %s1277_s3 = inlined_call_operand.vmem [shape: f32[512,64], index: 3, kind: output, shape index: {}]  }
   0x1   :  { %v85_v0 = vld [vmem:[%s1274_s1 + $0x38] sm:$0xff]  ;;  %v84_v1 = vld [vmem:[%s1274_s1 + $0x30] sm:$0xff]  ;;  %v83_v2 = vld [vmem:[%s1274_s1 + $0x28] sm:$0xff] }
   0x2   :  { %625 = vmatpush.msra.mxu2 %v85_v0  ;;  %626 = vmatpush.msra.mxu3 %v85_v0  ;;  %v82_v3 = vld [vmem:[%s1274_s1 + $0x20] sm:$0xff]  ;;  %v81_v4 = vld [vmem:[%s1274_s1 + $0x18] sm:$0xff]  ;;  %v80_v5 = vld [vmem:[%s1274_s1 + $0x10] sm:$0xff] }
   0x3   :  { %291 = vmatpush.msra.mxu0 %v85_v0  ;;  %624 = vmatpush.msra.mxu1 %v85_v0  ;;  %v79_v6 = vld [vmem:[%s1274_s1 + $0x8] sm:$0xff]  ;;  %v78_v7 = vld [vmem:[%s1274_s1] sm:$0xff]  ;;  %v48_v16 = vld [vmem:[%s1275_s0 + $0x110] sm:$0xff] }
   0x4   :  { %628 = vmatpush.msra.mxu2 %v84_v1  ;;  %629 = vmatpush.msra.mxu3 %v84_v1  ;;  %v46_v8 = vld [vmem:[%s1275_s0 + $0x100] sm:$0xff]  ;;  %v47_v12 = vld [vmem:[%s1275_s0 + $0x108] sm:$0xff]  ;;  %v64_v17 = vld [vmem:[%s1275_s0 + $0x190] sm:$0xff] }
   0x5   :  { %292 = vmatpush.msra.mxu0 %v84_v1  ;;  %627 = vmatpush.msra.mxu1 %v84_v1  ;;  %v62_v9 = vld [vmem:[%s1275_s0 + $0x180] sm:$0xff]  ;;  %v63_v13 = vld [vmem:[%s1275_s0 + $0x188] sm:$0xff]  ;;  %v16_v18 = vld [vmem:[%s1275_s0 + $0x10] sm:$0xff] }
   0x6   :  { %631 = vmatpush.msra.mxu2 %v83_v2  ;;  %632 = vmatpush.msra.mxu3 %v83_v2  ;;  %v14_v10 = vld [vmem:[%s1275_s0] sm:$0xff]  ;;  %v15_v14 = vld [vmem:[%s1275_s0 + $0x8] sm:$0xff]  ;;  %v32_v19 = vld [vmem:[%s1275_s0 + $0x90] sm:$0xff] }
   0x7   :  { %293 = vmatpush.msra.mxu0 %v83_v2  ;;  %630 = vmatpush.msra.mxu1 %v83_v2  ;;  %v30_v11 = vld [vmem:[%s1275_s0 + $0x80] sm:$0xff]  ;;  %v31_v15 = vld [vmem:[%s1275_s0 + $0x88] sm:$0xff]  ;;  %v49_v20 = vld [vmem:[%s1275_s0 + $0x118] sm:$0xff] }
   0x8   :  { %634 = vmatpush.msra.mxu2 %v82_v3  ;;  %635 = vmatpush.msra.mxu3 %v82_v3  ;;  %v65_v21 = vld [vmem:[%s1275_s0 + $0x198] sm:$0xff]  ;;  %v50_v24 = vld [vmem:[%s1275_s0 + $0x120] sm:$0xff]  ;;  %v51_v28 = vld [vmem:[%s1275_s0 + $0x128] sm:$0xff] }
   0x9   :  { %294 = vmatpush.msra.mxu0 %v82_v3  ;;  %633 = vmatpush.msra.mxu1 %v82_v3  ;;  %v17_v22 = vld [vmem:[%s1275_s0 + $0x18] sm:$0xff]  ;;  %v66_v25 = vld [vmem:[%s1275_s0 + $0x1a0] sm:$0xff]  ;;  %v67_v29 = vld [vmem:[%s1275_s0 + $0x1a8] sm:$0xff] }
   0xa   :  { %637 = vmatpush.msra.mxu2 %v81_v4  ;;  %638 = vmatpush.msra.mxu3 %v81_v4  ;;  %v33_v23 = vld [vmem:[%s1275_s0 + $0x98] sm:$0xff]  ;;  %v18_v26 = vld [vmem:[%s1275_s0 + $0x20] sm:$0xff]  ;;  %v19_v30 = vld [vmem:[%s1275_s0 + $0x28] sm:$0xff] }
   0xb   :  { %295 = vmatpush.msra.mxu0 %v81_v4  ;;  %636 = vmatpush.msra.mxu1 %v81_v4  ;;  %v34_v27 = vld [vmem:[%s1275_s0 + $0xa0] sm:$0xff]  ;;  %v35_v31 = vld [vmem:[%s1275_s0 + $0xa8] sm:$0xff]  ;;  %v52_v32 = vld [vmem:[%s1275_s0 + $0x130] sm:$0xff] }
   0xc   :  { %640 = vmatpush.msra.mxu2 %v80_v5  ;;  %641 = vmatpush.msra.mxu3 %v80_v5  ;;  %v68_v33 = vld [vmem:[%s1275_s0 + $0x1b0] sm:$0xff]  ;;  %v53_v36 = vld [vmem:[%s1275_s0 + $0x138] sm:$0xff]  ;;  %v54_v40 = vld [vmem:[%s1275_s0 + $0x140] sm:$0xff] }
   0xd   :  { %296 = vmatpush.msra.mxu0 %v80_v5  ;;  %639 = vmatpush.msra.mxu1 %v80_v5  ;;  %v20_v34 = vld [vmem:[%s1275_s0 + $0x30] sm:$0xff]  ;;  %v69_v37 = vld [vmem:[%s1275_s0 + $0x1b8] sm:$0xff]  ;;  %v70_v41 = vld [vmem:[%s1275_s0 + $0x1c0] sm:$0xff] }
   0xe   :  { %643 = vmatpush.msra.mxu2 %v79_v6  ;;  %644 = vmatpush.msra.mxu3 %v79_v6  ;;  %v36_v35 = vld [vmem:[%s1275_s0 + $0xb0] sm:$0xff]  ;;  %v21_v38 = vld [vmem:[%s1275_s0 + $0x38] sm:$0xff]  ;;  %v22_v42 = vld [vmem:[%s1275_s0 + $0x40] sm:$0xff] }
   0xf   :  { %297 = vmatpush.msra.mxu0 %v79_v6  ;;  %642 = vmatpush.msra.mxu1 %v79_v6  ;;  %v37_v39 = vld [vmem:[%s1275_s0 + $0xb8] sm:$0xff]  ;;  %v38_v43 = vld [vmem:[%s1275_s0 + $0xc0] sm:$0xff]  ;;  %v55_v44 = vld [vmem:[%s1275_s0 + $0x148] sm:$0xff] }
  0x10   :  { %646 = vmatpush.msra.mxu2 %v78_v7  ;;  %647 = vmatpush.msra.mxu3 %v78_v7  ;;  %v71_v45 = vld [vmem:[%s1275_s0 + $0x1c8] sm:$0xff]  ;;  %v56_v48 = vld [vmem:[%s1275_s0 + $0x150] sm:$0xff]  ;;  %v57_v52 = vld [vmem:[%s1275_s0 + $0x158] sm:$0xff] }
  0x11   :  { %592 = vmatmul.msk.f32.vlgmr.msra.gmra.mxu2 %vm90_vm0, %v46_v8  ;;  %608 = vmatmul.msk.f32.vlgmr.msra.gmra.mxu3 %vm90_vm0, %v62_v9  ;;  %v23_v46 = vld [vmem:[%s1275_s0 + $0x48] sm:$0xff]  ;;  %v72_v49 = vld [vmem:[%s1275_s0 + $0x1d0] sm:$0xff]  ;;  %v73_v53 = vld [vmem:[%s1275_s0 + $0x1d8] sm:$0xff] }
  0x12   :  { %298 = vmatpush.msra.mxu0 %v78_v7  ;;  %645 = vmatpush.msra.mxu1 %v78_v7  ;;  %v39_v47 = vld [vmem:[%s1275_s0 + $0xc8] sm:$0xff]  ;;  %v24_v50 = vld [vmem:[%s1275_s0 + $0x50] sm:$0xff]  ;;  %v25_v54 = vld [vmem:[%s1275_s0 + $0x58] sm:$0xff] }
  0x13   :  { %560 = vmatmul.msk.f32.vlgmr.msra.gmra.mxu0 %vm90_vm0, %v14_v10  ;;  %576 = vmatmul.msk.f32.vlgmr.msra.gmra.mxu1 %vm90_vm0, %v30_v11  ;;  %v40_v51 = vld [vmem:[%s1275_s0 + $0xd0] sm:$0xff]  ;;  %v41_v55 = vld [vmem:[%s1275_s0 + $0xd8] sm:$0xff]  ;;  %v58_v56 = vld [vmem:[%s1275_s0 + $0x160] sm:$0xff] }
  0x14   :  { %v74_v57 = vld [vmem:[%s1275_s0 + $0x1e0] sm:$0xff]  ;;  %v59_v60 = vld [vmem:[%s1275_s0 + $0x168] sm:$0xff]  ;;  %v60_v0 = vld [vmem:[%s1275_s0 + $0x170] sm:$0xff] }
  0x15   :  { %v26_v58 = vld [vmem:[%s1275_s0 + $0x60] sm:$0xff]  ;;  %v75_v61 = vld [vmem:[%s1275_s0 + $0x1e8] sm:$0xff]  ;;  %v76_v1 = vld [vmem:[%s1275_s0 + $0x1f0] sm:$0xff] }
  0x16   :  { %v42_v59 = vld [vmem:[%s1275_s0 + $0xe0] sm:$0xff]  ;;  %v27_v62 = vld [vmem:[%s1275_s0 + $0x68] sm:$0xff]  ;;  %v28_v2 = vld [vmem:[%s1275_s0 + $0x70] sm:$0xff] }
  0x17   :  { %v43_v63 = vld [vmem:[%s1275_s0 + $0xe8] sm:$0xff]  ;;  %v44_v3 = vld [vmem:[%s1275_s0 + $0xf0] sm:$0xff]  ;;  %v61_v4 = vld [vmem:[%s1275_s0 + $0x178] sm:$0xff] }
  0x18   :  { %v77_v5 = vld [vmem:[%s1275_s0 + $0x1f8] sm:$0xff]  ;;  %v952_v8 = vld [vmem:[%s1276_s2] ss:$0 sm:$0xff] }
  0x19   :  { %593 = vmatmul.msk.f32.gmra.mxu2 %vm90_vm0, %v47_v12  ;;  %609 = vmatmul.msk.f32.gmra.mxu3 %vm90_vm0, %v63_v13  ;;  %v29_v6 = vld [vmem:[%s1275_s0 + $0x78] sm:$0xff] }
  0x1a   :  { %v45_v7 = vld [vmem:[%s1275_s0 + $0xf8] sm:$0xff] }
  0x1b   :  { %561 = vmatmul.msk.f32.gmra.mxu0 %vm90_vm0, %v15_v14  ;;  %577 = vmatmul.msk.f32.gmra.mxu1 %vm90_vm0, %v31_v15 }
  0x21   :  { %594 = vmatmul.msk.f32.gmra.mxu2 %vm90_vm0, %v48_v16  ;;  %610 = vmatmul.msk.f32.gmra.mxu3 %vm90_vm0, %v64_v17 }
  0x23   :  { %562 = vmatmul.msk.f32.gmra.mxu0 %vm90_vm0, %v16_v18  ;;  %578 = vmatmul.msk.f32.gmra.mxu1 %vm90_vm0, %v32_v19 }
  0x29   :  { %595 = vmatmul.msk.f32.gmra.mxu2 %vm90_vm0, %v49_v20  ;;  %611 = vmatmul.msk.f32.gmra.mxu3 %vm90_vm0, %v65_v21 }
  0x2b   :  { %563 = vmatmul.msk.f32.gmra.mxu0 %vm90_vm0, %v17_v22  ;;  %579 = vmatmul.msk.f32.gmra.mxu1 %vm90_vm0, %v33_v23 }
  0x31   :  { %596 = vmatmul.msk.f32.gmra.mxu2 %vm90_vm0, %v50_v24  ;;  %612 = vmatmul.msk.f32.gmra.mxu3 %vm90_vm0, %v66_v25 }
  0x33   :  { %564 = vmatmul.msk.f32.gmra.mxu0 %vm90_vm0, %v18_v26  ;;  %580 = vmatmul.msk.f32.gmra.mxu1 %vm90_vm0, %v34_v27 }
  0x39   :  { %597 = vmatmul.msk.f32.gmra.mxu2 %vm90_vm0, %v51_v28  ;;  %613 = vmatmul.msk.f32.gmra.mxu3 %vm90_vm0, %v67_v29 }
  0x3b   :  { %565 = vmatmul.msk.f32.gmra.mxu0 %vm90_vm0, %v19_v30  ;;  %581 = vmatmul.msk.f32.gmra.mxu1 %vm90_vm0, %v35_v31 }
  0x41   :  { %598 = vmatmul.msk.f32.gmra.mxu2 %vm90_vm0, %v52_v32  ;;  %614 = vmatmul.msk.f32.gmra.mxu3 %vm90_vm0, %v68_v33 }
  0x43   :  { %566 = vmatmul.msk.f32.gmra.mxu0 %vm90_vm0, %v20_v34  ;;  %582 = vmatmul.msk.f32.gmra.mxu1 %vm90_vm0, %v36_v35 }
  0x49   :  { %599 = vmatmul.msk.f32.gmra.mxu2 %vm90_vm0, %v53_v36  ;;  %615 = vmatmul.msk.f32.gmra.mxu3 %vm90_vm0, %v69_v37 }
  0x4b   :  { %567 = vmatmul.msk.f32.gmra.mxu0 %vm90_vm0, %v21_v38  ;;  %583 = vmatmul.msk.f32.gmra.mxu1 %vm90_vm0, %v37_v39 }
  0x51   :  { %600 = vmatmul.msk.f32.gmra.mxu2 %vm90_vm0, %v54_v40  ;;  %616 = vmatmul.msk.f32.gmra.mxu3 %vm90_vm0, %v70_v41 }
  0x53   :  { %568 = vmatmul.msk.f32.gmra.mxu0 %vm90_vm0, %v22_v42  ;;  %584 = vmatmul.msk.f32.gmra.mxu1 %vm90_vm0, %v38_v43 }
  0x59   :  { %601 = vmatmul.msk.f32.gmra.mxu2 %vm90_vm0, %v55_v44  ;;  %617 = vmatmul.msk.f32.gmra.mxu3 %vm90_vm0, %v71_v45 }
  0x5b   :  { %569 = vmatmul.msk.f32.gmra.mxu0 %vm90_vm0, %v23_v46  ;;  %585 = vmatmul.msk.f32.gmra.mxu1 %vm90_vm0, %v39_v47 }
  0x61   :  { %602 = vmatmul.msk.f32.gmra.mxu2 %vm90_vm0, %v56_v48  ;;  %618 = vmatmul.msk.f32.gmra.mxu3 %vm90_vm0, %v72_v49 }
  0x63   :  { %570 = vmatmul.msk.f32.gmra.mxu0 %vm90_vm0, %v24_v50  ;;  %586 = vmatmul.msk.f32.gmra.mxu1 %vm90_vm0, %v40_v51 }
  0x69   :  { %603 = vmatmul.msk.f32.gmra.mxu2 %vm90_vm0, %v57_v52  ;;  %619 = vmatmul.msk.f32.gmra.mxu3 %vm90_vm0, %v73_v53 }
  0x6b   :  { %571 = vmatmul.msk.f32.gmra.mxu0 %vm90_vm0, %v25_v54  ;;  %587 = vmatmul.msk.f32.gmra.mxu1 %vm90_vm0, %v41_v55 }
  0x71   :  { %604 = vmatmul.msk.f32.gmra.mxu2 %vm90_vm0, %v58_v56  ;;  %620 = vmatmul.msk.f32.gmra.mxu3 %vm90_vm0, %v74_v57 }
  0x73   :  { %572 = vmatmul.msk.f32.gmra.mxu0 %vm90_vm0, %v26_v58  ;;  %588 = vmatmul.msk.f32.gmra.mxu1 %vm90_vm0, %v42_v59 }
  0x79   :  { %605 = vmatmul.msk.f32.gmra.mxu2 %vm90_vm0, %v59_v60  ;;  %621 = vmatmul.msk.f32.gmra.mxu3 %vm90_vm0, %v75_v61 }
  0x7b   :  { %573 = vmatmul.msk.f32.gmra.mxu0 %vm90_vm0, %v27_v62  ;;  %589 = vmatmul.msk.f32.gmra.mxu1 %vm90_vm0, %v43_v63 }
  0x81   :  { %606 = vmatmul.msk.f32.gmra.mxu2 %vm90_vm0, %v60_v0  ;;  %622 = vmatmul.msk.f32.gmra.mxu3 %vm90_vm0, %v76_v1 }
  0x83   :  { %574 = vmatmul.msk.f32.gmra.mxu0 %vm90_vm0, %v28_v2  ;;  %590 = vmatmul.msk.f32.gmra.mxu1 %vm90_vm0, %v44_v3 }
  0x89   :  { %607 = vmatmul.msk.f32.gmra.mxu2 %vm90_vm0, %v61_v4  ;;  %623 = vmatmul.msk.f32.gmra.mxu3 %vm90_vm0, %v77_v5 }
  0x8b   :  { %575 = vmatmul.msk.f32.gmra.mxu0 %vm90_vm0, %v29_v6  ;;  %591 = vmatmul.msk.f32.gmra.mxu1 %vm90_vm0, %v45_v7 }
  0x90   :  { %v300_v9 = vpop.f32.mrf.mxu0  ;;  %v348_v10 = vpop.f32.mrf.mxu1 }
  0x91   :  { %v301_v11 = vadd.f32 %v952_v8, %v300_v9  ;;  %v349_v12 = vadd.f32 %v952_v8, %v348_v10 }
  0x93   :  { %492 = vst.msk [vmem:[%s1277_s3] sm:$0xff] %vm90_vm0, %v301_v11 }
  0x94   :  { %508 = vst.msk [vmem:[%s1277_s3 + $0x80] sm:$0xff] %vm90_vm0, %v349_v12  ;;  %v396_v13 = vpop.f32.mrf.mxu2  ;;  %v444_v14 = vpop.f32.mrf.mxu3 }
  0x95   :  { %v397_v15 = vadd.f32 %v952_v8, %v396_v13  ;;  %v445_v16 = vadd.f32 %v952_v8, %v444_v14 }
  0x97   :  { %524 = vst.msk [vmem:[%s1277_s3 + $0x100] sm:$0xff] %vm90_vm0, %v397_v15 }
  0x98   :  { %540 = vst.msk [vmem:[%s1277_s3 + $0x180] sm:$0xff] %vm90_vm0, %v445_v16  ;;  %v303_v17 = vpop.f32.mrf.mxu0  ;;  %v351_v18 = vpop.f32.mrf.mxu1 }
  0x99   :  { %v304_v19 = vadd.f32 %v952_v8, %v303_v17  ;;  %v352_v20 = vadd.f32 %v952_v8, %v351_v18 }
  0x9b   :  { %493 = vst.msk [vmem:[%s1277_s3 + $0x8] sm:$0xff] %vm90_vm0, %v304_v19 }
  0x9c   :  { %509 = vst.msk [vmem:[%s1277_s3 + $0x88] sm:$0xff] %vm90_vm0, %v352_v20  ;;  %v399_v21 = vpop.f32.mrf.mxu2  ;;  %v447_v22 = vpop.f32.mrf.mxu3 }
  0x9d   :  { %v400_v23 = vadd.f32 %v952_v8, %v399_v21  ;;  %v448_v24 = vadd.f32 %v952_v8, %v447_v22 }
  0x9f   :  { %525 = vst.msk [vmem:[%s1277_s3 + $0x108] sm:$0xff] %vm90_vm0, %v400_v23 }
  0xa0   :  { %541 = vst.msk [vmem:[%s1277_s3 + $0x188] sm:$0xff] %vm90_vm0, %v448_v24  ;;  %v306_v25 = vpop.f32.mrf.mxu0  ;;  %v354_v26 = vpop.f32.mrf.mxu1 }
  0xa1   :  { %v307_v27 = vadd.f32 %v952_v8, %v306_v25  ;;  %v355_v28 = vadd.f32 %v952_v8, %v354_v26 }
  0xa3   :  { %494 = vst.msk [vmem:[%s1277_s3 + $0x10] sm:$0xff] %vm90_vm0, %v307_v27 }
  0xa4   :  { %510 = vst.msk [vmem:[%s1277_s3 + $0x90] sm:$0xff] %vm90_vm0, %v355_v28  ;;  %v402_v29 = vpop.f32.mrf.mxu2  ;;  %v450_v30 = vpop.f32.mrf.mxu3 }
  0xa5   :  { %v403_v31 = vadd.f32 %v952_v8, %v402_v29  ;;  %v451_v32 = vadd.f32 %v952_v8, %v450_v30 }
  0xa7   :  { %526 = vst.msk [vmem:[%s1277_s3 + $0x110] sm:$0xff] %vm90_vm0, %v403_v31 }
  0xa8   :  { %542 = vst.msk [vmem:[%s1277_s3 + $0x190] sm:$0xff] %vm90_vm0, %v451_v32  ;;  %v309_v33 = vpop.f32.mrf.mxu0  ;;  %v357_v34 = vpop.f32.mrf.mxu1 }
  0xa9   :  { %v310_v35 = vadd.f32 %v952_v8, %v309_v33  ;;  %v358_v36 = vadd.f32 %v952_v8, %v357_v34 }
  0xab   :  { %495 = vst.msk [vmem:[%s1277_s3 + $0x18] sm:$0xff] %vm90_vm0, %v310_v35 }
  0xac   :  { %511 = vst.msk [vmem:[%s1277_s3 + $0x98] sm:$0xff] %vm90_vm0, %v358_v36  ;;  %v405_v37 = vpop.f32.mrf.mxu2  ;;  %v453_v38 = vpop.f32.mrf.mxu3 }
  0xad   :  { %v406_v39 = vadd.f32 %v952_v8, %v405_v37  ;;  %v454_v40 = vadd.f32 %v952_v8, %v453_v38 }
  0xaf   :  { %527 = vst.msk [vmem:[%s1277_s3 + $0x118] sm:$0xff] %vm90_vm0, %v406_v39 }
  0xb0   :  { %543 = vst.msk [vmem:[%s1277_s3 + $0x198] sm:$0xff] %vm90_vm0, %v454_v40  ;;  %v312_v41 = vpop.f32.mrf.mxu0  ;;  %v360_v42 = vpop.f32.mrf.mxu1 }
  0xb1   :  { %v313_v43 = vadd.f32 %v952_v8, %v312_v41  ;;  %v361_v44 = vadd.f32 %v952_v8, %v360_v42 }
  0xb3   :  { %496 = vst.msk [vmem:[%s1277_s3 + $0x20] sm:$0xff] %vm90_vm0, %v313_v43 }
  0xb4   :  { %512 = vst.msk [vmem:[%s1277_s3 + $0xa0] sm:$0xff] %vm90_vm0, %v361_v44  ;;  %v408_v45 = vpop.f32.mrf.mxu2  ;;  %v456_v46 = vpop.f32.mrf.mxu3 }
  0xb5   :  { %v409_v47 = vadd.f32 %v952_v8, %v408_v45  ;;  %v457_v48 = vadd.f32 %v952_v8, %v456_v46 }
  0xb7   :  { %528 = vst.msk [vmem:[%s1277_s3 + $0x120] sm:$0xff] %vm90_vm0, %v409_v47 }
  0xb8   :  { %544 = vst.msk [vmem:[%s1277_s3 + $0x1a0] sm:$0xff] %vm90_vm0, %v457_v48  ;;  %v315_v49 = vpop.f32.mrf.mxu0  ;;  %v363_v50 = vpop.f32.mrf.mxu1 }
  0xb9   :  { %v316_v51 = vadd.f32 %v952_v8, %v315_v49  ;;  %v364_v52 = vadd.f32 %v952_v8, %v363_v50 }
  0xbb   :  { %497 = vst.msk [vmem:[%s1277_s3 + $0x28] sm:$0xff] %vm90_vm0, %v316_v51 }
  0xbc   :  { %513 = vst.msk [vmem:[%s1277_s3 + $0xa8] sm:$0xff] %vm90_vm0, %v364_v52  ;;  %v411_v53 = vpop.f32.mrf.mxu2  ;;  %v459_v54 = vpop.f32.mrf.mxu3 }
  0xbd   :  { %v412_v55 = vadd.f32 %v952_v8, %v411_v53  ;;  %v460_v56 = vadd.f32 %v952_v8, %v459_v54 }
  0xbf   :  { %529 = vst.msk [vmem:[%s1277_s3 + $0x128] sm:$0xff] %vm90_vm0, %v412_v55 }
  0xc0   :  { %545 = vst.msk [vmem:[%s1277_s3 + $0x1a8] sm:$0xff] %vm90_vm0, %v460_v56  ;;  %v318_v57 = vpop.f32.mrf.mxu0  ;;  %v366_v58 = vpop.f32.mrf.mxu1 }
  0xc1   :  { %v319_v59 = vadd.f32 %v952_v8, %v318_v57  ;;  %v367_v60 = vadd.f32 %v952_v8, %v366_v58 }
  0xc3   :  { %498 = vst.msk [vmem:[%s1277_s3 + $0x30] sm:$0xff] %vm90_vm0, %v319_v59 }
  0xc4   :  { %514 = vst.msk [vmem:[%s1277_s3 + $0xb0] sm:$0xff] %vm90_vm0, %v367_v60  ;;  %v414_v61 = vpop.f32.mrf.mxu2  ;;  %v462_v62 = vpop.f32.mrf.mxu3 }
  0xc5   :  { %v415_v63 = vadd.f32 %v952_v8, %v414_v61  ;;  %v463_v0 = vadd.f32 %v952_v8, %v462_v62 }
  0xc7   :  { %530 = vst.msk [vmem:[%s1277_s3 + $0x130] sm:$0xff] %vm90_vm0, %v415_v63 }
  0xc8   :  { %546 = vst.msk [vmem:[%s1277_s3 + $0x1b0] sm:$0xff] %vm90_vm0, %v463_v0  ;;  %v321_v1 = vpop.f32.mrf.mxu0  ;;  %v369_v2 = vpop.f32.mrf.mxu1 }
  0xc9   :  { %v322_v3 = vadd.f32 %v952_v8, %v321_v1  ;;  %v370_v4 = vadd.f32 %v952_v8, %v369_v2 }
  0xcb   :  { %499 = vst.msk [vmem:[%s1277_s3 + $0x38] sm:$0xff] %vm90_vm0, %v322_v3 }
  0xcc   :  { %515 = vst.msk [vmem:[%s1277_s3 + $0xb8] sm:$0xff] %vm90_vm0, %v370_v4  ;;  %v417_v5 = vpop.f32.mrf.mxu2  ;;  %v465_v6 = vpop.f32.mrf.mxu3 }
  0xcd   :  { %v418_v7 = vadd.f32 %v952_v8, %v417_v5  ;;  %v466_v9 = vadd.f32 %v952_v8, %v465_v6 }
  0xcf   :  { %531 = vst.msk [vmem:[%s1277_s3 + $0x138] sm:$0xff] %vm90_vm0, %v418_v7 }
  0xd0   :  { %547 = vst.msk [vmem:[%s1277_s3 + $0x1b8] sm:$0xff] %vm90_vm0, %v466_v9  ;;  %v324_v10 = vpop.f32.mrf.mxu0  ;;  %v372_v11 = vpop.f32.mrf.mxu1 }
  0xd1   :  { %v325_v12 = vadd.f32 %v952_v8, %v324_v10  ;;  %v373_v13 = vadd.f32 %v952_v8, %v372_v11 }
  0xd3   :  { %500 = vst.msk [vmem:[%s1277_s3 + $0x40] sm:$0xff] %vm90_vm0, %v325_v12 }
  0xd4   :  { %516 = vst.msk [vmem:[%s1277_s3 + $0xc0] sm:$0xff] %vm90_vm0, %v373_v13  ;;  %v420_v14 = vpop.f32.mrf.mxu2  ;;  %v468_v15 = vpop.f32.mrf.mxu3 }
  0xd5   :  { %v421_v16 = vadd.f32 %v952_v8, %v420_v14  ;;  %v469_v17 = vadd.f32 %v952_v8, %v468_v15 }
  0xd7   :  { %532 = vst.msk [vmem:[%s1277_s3 + $0x140] sm:$0xff] %vm90_vm0, %v421_v16 }
  0xd8   :  { %548 = vst.msk [vmem:[%s1277_s3 + $0x1c0] sm:$0xff] %vm90_vm0, %v469_v17  ;;  %v327_v18 = vpop.f32.mrf.mxu0  ;;  %v375_v19 = vpop.f32.mrf.mxu1 }
  0xd9   :  { %v328_v20 = vadd.f32 %v952_v8, %v327_v18  ;;  %v376_v21 = vadd.f32 %v952_v8, %v375_v19 }
  0xdb   :  { %501 = vst.msk [vmem:[%s1277_s3 + $0x48] sm:$0xff] %vm90_vm0, %v328_v20 }
  0xdc   :  { %517 = vst.msk [vmem:[%s1277_s3 + $0xc8] sm:$0xff] %vm90_vm0, %v376_v21  ;;  %v423_v22 = vpop.f32.mrf.mxu2  ;;  %v471_v23 = vpop.f32.mrf.mxu3 }
  0xdd   :  { %v424_v24 = vadd.f32 %v952_v8, %v423_v22  ;;  %v472_v25 = vadd.f32 %v952_v8, %v471_v23 }
  0xdf   :  { %533 = vst.msk [vmem:[%s1277_s3 + $0x148] sm:$0xff] %vm90_vm0, %v424_v24 }
  0xe0   :  { %549 = vst.msk [vmem:[%s1277_s3 + $0x1c8] sm:$0xff] %vm90_vm0, %v472_v25  ;;  %v330_v26 = vpop.f32.mrf.mxu0  ;;  %v378_v27 = vpop.f32.mrf.mxu1 }
  0xe1   :  { %v331_v28 = vadd.f32 %v952_v8, %v330_v26  ;;  %v379_v29 = vadd.f32 %v952_v8, %v378_v27 }
  0xe3   :  { %502 = vst.msk [vmem:[%s1277_s3 + $0x50] sm:$0xff] %vm90_vm0, %v331_v28 }
  0xe4   :  { %518 = vst.msk [vmem:[%s1277_s3 + $0xd0] sm:$0xff] %vm90_vm0, %v379_v29  ;;  %v426_v30 = vpop.f32.mrf.mxu2  ;;  %v474_v31 = vpop.f32.mrf.mxu3 }
  0xe5   :  { %v427_v32 = vadd.f32 %v952_v8, %v426_v30  ;;  %v475_v33 = vadd.f32 %v952_v8, %v474_v31 }
  0xe7   :  { %534 = vst.msk [vmem:[%s1277_s3 + $0x150] sm:$0xff] %vm90_vm0, %v427_v32 }
  0xe8   :  { %550 = vst.msk [vmem:[%s1277_s3 + $0x1d0] sm:$0xff] %vm90_vm0, %v475_v33  ;;  %v333_v34 = vpop.f32.mrf.mxu0  ;;  %v381_v35 = vpop.f32.mrf.mxu1 }
  0xe9   :  { %v334_v36 = vadd.f32 %v952_v8, %v333_v34  ;;  %v382_v37 = vadd.f32 %v952_v8, %v381_v35 }
  0xeb   :  { %503 = vst.msk [vmem:[%s1277_s3 + $0x58] sm:$0xff] %vm90_vm0, %v334_v36 }
  0xec   :  { %519 = vst.msk [vmem:[%s1277_s3 + $0xd8] sm:$0xff] %vm90_vm0, %v382_v37  ;;  %v429_v38 = vpop.f32.mrf.mxu2  ;;  %v477_v39 = vpop.f32.mrf.mxu3 }
  0xed   :  { %v430_v40 = vadd.f32 %v952_v8, %v429_v38  ;;  %v478_v41 = vadd.f32 %v952_v8, %v477_v39 }
  0xef   :  { %535 = vst.msk [vmem:[%s1277_s3 + $0x158] sm:$0xff] %vm90_vm0, %v430_v40 }
  0xf0   :  { %551 = vst.msk [vmem:[%s1277_s3 + $0x1d8] sm:$0xff] %vm90_vm0, %v478_v41  ;;  %v336_v42 = vpop.f32.mrf.mxu0  ;;  %v384_v43 = vpop.f32.mrf.mxu1 }
  0xf1   :  { %v337_v44 = vadd.f32 %v952_v8, %v336_v42  ;;  %v385_v45 = vadd.f32 %v952_v8, %v384_v43 }
  0xf3   :  { %504 = vst.msk [vmem:[%s1277_s3 + $0x60] sm:$0xff] %vm90_vm0, %v337_v44 }
  0xf4   :  { %520 = vst.msk [vmem:[%s1277_s3 + $0xe0] sm:$0xff] %vm90_vm0, %v385_v45  ;;  %v432_v46 = vpop.f32.mrf.mxu2  ;;  %v480_v47 = vpop.f32.mrf.mxu3 }
  0xf5   :  { %v433_v48 = vadd.f32 %v952_v8, %v432_v46  ;;  %v481_v49 = vadd.f32 %v952_v8, %v480_v47 }
  0xf7   :  { %536 = vst.msk [vmem:[%s1277_s3 + $0x160] sm:$0xff] %vm90_vm0, %v433_v48 }
  0xf8   :  { %552 = vst.msk [vmem:[%s1277_s3 + $0x1e0] sm:$0xff] %vm90_vm0, %v481_v49  ;;  %v339_v50 = vpop.f32.mrf.mxu0  ;;  %v387_v51 = vpop.f32.mrf.mxu1 }
  0xf9   :  { %v340_v52 = vadd.f32 %v952_v8, %v339_v50  ;;  %v388_v53 = vadd.f32 %v952_v8, %v387_v51 }
  0xfb   :  { %505 = vst.msk [vmem:[%s1277_s3 + $0x68] sm:$0xff] %vm90_vm0, %v340_v52 }
  0xfc   :  { %521 = vst.msk [vmem:[%s1277_s3 + $0xe8] sm:$0xff] %vm90_vm0, %v388_v53  ;;  %v435_v54 = vpop.f32.mrf.mxu2  ;;  %v483_v55 = vpop.f32.mrf.mxu3 }
  0xfd   :  { %v436_v56 = vadd.f32 %v952_v8, %v435_v54  ;;  %v484_v57 = vadd.f32 %v952_v8, %v483_v55 }
  0xff   :  { %537 = vst.msk [vmem:[%s1277_s3 + $0x168] sm:$0xff] %vm90_vm0, %v436_v56 }
 0x100   :  { %553 = vst.msk [vmem:[%s1277_s3 + $0x1e8] sm:$0xff] %vm90_vm0, %v484_v57  ;;  %v342_v58 = vpop.f32.mrf.mxu0  ;;  %v390_v59 = vpop.f32.mrf.mxu1 }
 0x101   :  { %v343_v60 = vadd.f32 %v952_v8, %v342_v58  ;;  %v391_v61 = vadd.f32 %v952_v8, %v390_v59 }
 0x103   :  { %506 = vst.msk [vmem:[%s1277_s3 + $0x70] sm:$0xff] %vm90_vm0, %v343_v60 }
 0x104   :  { %522 = vst.msk [vmem:[%s1277_s3 + $0xf0] sm:$0xff] %vm90_vm0, %v391_v61  ;;  %v438_v62 = vpop.f32.mrf.mxu2  ;;  %v486_v63 = vpop.f32.mrf.mxu3 }
 0x105   :  { %v439_v0 = vadd.f32 %v952_v8, %v438_v62  ;;  %v487_v1 = vadd.f32 %v952_v8, %v486_v63 }
 0x107   :  { %538 = vst.msk [vmem:[%s1277_s3 + $0x170] sm:$0xff] %vm90_vm0, %v439_v0 }
 0x108   :  { %554 = vst.msk [vmem:[%s1277_s3 + $0x1f0] sm:$0xff] %vm90_vm0, %v487_v1  ;;  %v345_v2 = vpop.f32.mrf.mxu0  ;;  %v393_v3 = vpop.f32.mrf.mxu1 }
 0x109   :  { %v346_v4 = vadd.f32 %v952_v8, %v345_v2  ;;  %v394_v5 = vadd.f32 %v952_v8, %v393_v3 }
 0x10b   :  { %507 = vst.msk [vmem:[%s1277_s3 + $0x78] sm:$0xff] %vm90_vm0, %v346_v4 }
 0x10c   :  { %523 = vst.msk [vmem:[%s1277_s3 + $0xf8] sm:$0xff] %vm90_vm0, %v394_v5  ;;  %v441_v6 = vpop.f32.mrf.mxu2  ;;  %v489_v7 = vpop.f32.mrf.mxu3 }
 0x10d   :  { %v442_v9 = vadd.f32 %v952_v8, %v441_v6  ;;  %v490_v10 = vadd.f32 %v952_v8, %v489_v7 }
 0x10f   :  { %539 = vst.msk [vmem:[%s1277_s3 + $0x178] sm:$0xff] %vm90_vm0, %v442_v9 }
 0x110   :  { %555 = vst.msk [vmem:[%s1277_s3 + $0x1f8] sm:$0xff] %vm90_vm0, %v490_v10 }

</bundles_post_ra>
